<compile_context>
chip_gen: v7x
topology: tpu7x:2x2x1
jax: 0.10.0
libtpu: 0.0.40
codegen_flags: <defaults>
</compile_context>

<pallas_src>
import math

import jax
import jax.numpy as jnp
import numpy as np
from jax.experimental import pallas as pl
from jax.experimental.pallas import tpu as pltpu

# Explicit scoped-VMEM cap: leaves headroom on v7x (64 MiB physical/TC) while
# being well above the few MiB these tiles actually use.
VMEM_LIMIT = 48 * 1024 * 1024


def _largest_divisor(n, cap):
    """Largest divisor of n that is <= cap (>= 1)."""
    for d in range(min(n, cap), 0, -1):
        if n % d == 0:
            return d
    return 1


def _tile(dim, preferred, quantum):
    """Largest tile <= `preferred` that divides `dim` and is a multiple of
    `quantum` (8 for sublane dims, 128 for lane dims); full extent if the dim
    is already small.  Avoids the old full-extent fallback that could blow
    v7x's 64 MiB VMEM for non-divisible shapes."""
    if dim <= preferred:
        return dim
    t = (preferred // quantum) * quantum
    while t >= quantum:
        if dim % t == 0:
            return t
        t -= quantum
    # TODO(synk): no (8,128)-legal divisor <= preferred exists; fall back to
    # the full extent (only hit for pathological dims).
    return dim


def _group_heads(w2d, n_heads, head_dim, group):
    """(E, n_heads*D) torch-Linear-style weight -> grouped (n_heads/G, E, G*D)
    layout consumed by head_proj (one-time at init, no per-call transposes)."""
    E = w2d.shape[0]
    G, D = group, head_dim
    w = w2d.reshape(E, n_heads, D).transpose(1, 0, 2)          # (H, E, D)
    w = w.reshape(n_heads // G, G, E, D).transpose(0, 2, 1, 3)  # (H/G, E, G, D)
    return w.reshape(n_heads // G, E, G * D)


# ---------------------------------------------------------------------------
# Grouped per-head projections: out[b, hg*G+g] = x[b] @ W[head]  (K innermost)
# Optional fused RoPE in the final-K epilogue (scale already folded into Wq).
# ---------------------------------------------------------------------------
def _head_proj_rope_kernel(x_ref, w_ref, cos_ref, sin_ref, o_ref, acc_ref):
    ki = pl.program_id(3)

    @pl.when(ki == 0)
    def _():
        acc_ref[...] = jnp.zeros_like(acc_ref)

    acc_ref[...] += jnp.dot(x_ref[0], w_ref[0], preferred_element_type=jnp.float32)

    @pl.when(ki == pl.num_programs(3) - 1)
    def _():
        G, D = o_ref.shape[1], o_ref.shape[3]
        half = D // 2
        xh = acc_ref[...]                         # (tq, G*D) f32
        cos = cos_ref[0].astype(jnp.float32)      # (tq, D) head-invariant
        sinf = sin_ref[0].astype(jnp.float32)     # sign-folded sin (-s | +s)
        for g in range(G):                        # static, G small
            xg = xh[:, g * D:(g + 1) * D]
            if D % 128 == 0:
                # rotate_half realised as a lane roll (XLU slot, epilogue-only)
                rot = pltpu.roll(xg, half, 1)     # [x2, x1]; sign is in sinf
            else:
                rot = jnp.concatenate([xg[:, half:], xg[:, :half]], axis=1)
            o_ref[0, g] = (xg * cos + rot * sinf).astype(o_ref.dtype)


def _head_proj_kernel(x_ref, w_ref, o_ref, acc_ref):
    ki = pl.program_id(3)

    @pl.when(ki == 0)
    def _():
        acc_ref[...] = jnp.zeros_like(acc_ref)

    acc_ref[...] += jnp.dot(x_ref[0], w_ref[0], preferred_element_type=jnp.float32)

    @pl.when(ki == pl.num_programs(3) - 1)
    def _():
        G, D = o_ref.shape[1], o_ref.shape[3]
        xh = acc_ref[...]
        for g in range(G):
            o_ref[0, g] = xh[:, g * D:(g + 1) * D].astype(o_ref.dtype)


def head_proj(x, w_grouped, cos=None, sin_folded=None, *, head_dim, tq=256, tk=512):
    """x: (B, S, E), w_grouped: (H/G, E, G*D) -> (B, H, S, D); optional RoPE."""
    B, S, E = x.shape
    Hg, _, GD = w_grouped.shape
    D = head_dim
    G = GD // D
    Hx = Hg * G
    tq = _tile(S, tq, 8)
    tk = _tile(E, tk, 128)
    grid = (B, Hg, S // tq, E // tk)

    x_spec = pl.BlockSpec((1, tq, tk), lambda b, hg, qi, ki: (b, qi, ki))
    w_spec = pl.BlockSpec((1, tk, GD), lambda b, hg, qi, ki: (hg, ki, 0))
    o_spec = pl.BlockSpec((1, G, tq, D), lambda b, hg, qi, ki: (b, hg, qi, 0))
    rope_spec = pl.BlockSpec((1, tq, D), lambda b, hg, qi, ki: (b, qi, 0))

    if cos is not None:
        kernel = _head_proj_rope_kernel
        in_specs = [x_spec, w_spec, rope_spec, rope_spec]
        args = (x, w_grouped, cos, sin_folded)
    else:
        kernel = _head_proj_kernel
        in_specs = [x_spec, w_spec]
        args = (x, w_grouped)

    return pl.pallas_call(
        kernel,
        out_shape=jax.ShapeDtypeStruct((B, Hx, S, D), x.dtype),
        grid=grid,
        in_specs=in_specs,
        out_specs=o_spec,
        scratch_shapes=[pltpu.VMEM((tq, GD), jnp.float32)],
        compiler_params=pltpu.CompilerParams(
            dimension_semantics=("parallel", "parallel", "parallel", "arbitrary"),
            vmem_limit_bytes=VMEM_LIMIT,
        ),
    )(*args)


# ---------------------------------------------------------------------------
# Output projection: y[b,s] = sum_h attn[b,h,s] @ Wo[h], Hb heads per step
# ---------------------------------------------------------------------------
def _out_proj_kernel(x_ref, w_ref, o_ref, acc_ref):
    hb = pl.program_id(3)
    Hb = w_ref.shape[0]

    @pl.when(hb == 0)
    def _():
        acc_ref[...] = jnp.zeros_like(acc_ref)

    acc = acc_ref[...]
    for h in range(Hb):                           # static, Hb small
        acc = acc + jnp.dot(x_ref[0, h], w_ref[h],
                            preferred_element_type=jnp.float32)
    acc_ref[...] = acc

    @pl.when(hb == pl.num_programs(3) - 1)
    def _():
        o_ref[0] = acc_ref[...].astype(o_ref.dtype)


def out_proj(x, w_heads, *, tq=512, tn=512, max_hb=8):
    """x: (B, H, S, D), w_heads: (H, D, E) -> (B, S, E)."""
    B, H, S, D = x.shape
    _, _, E = w_heads.shape
    Hb = _largest_divisor(H, max_hb)
    tq = _tile(S, tq, 8)
    tn = _tile(E, tn, 128)
    grid = (B, S // tq, E // tn, H // Hb)
    return pl.pallas_call(
        _out_proj_kernel,
        out_shape=jax.ShapeDtypeStruct((B, S, E), x.dtype),
        grid=grid,
        in_specs=[
            pl.BlockSpec((1, Hb, tq, D), lambda b, qi, j, hb: (b, hb, qi, 0)),
            pl.BlockSpec((Hb, D, tn), lambda b, qi, j, hb: (hb, 0, j)),
        ],
        out_specs=pl.BlockSpec((1, tq, tn), lambda b, qi, j, hb: (b, qi, j)),
        scratch_shapes=[pltpu.VMEM((tq, tn), jnp.float32)],
        compiler_params=pltpu.CompilerParams(
            dimension_semantics=("parallel", "parallel", "parallel", "arbitrary"),
            vmem_limit_bytes=VMEM_LIMIT,
        ),
    )(x, w_heads)


# ---------------------------------------------------------------------------
# Flash attention with the GQA group folded into the Q tile:
# grid (B, Hkv, Sq_tiles, Sk_tiles); K/V fetched once per kv head.
# ---------------------------------------------------------------------------
def _flash_attn_kernel(q_ref, k_ref, v_ref, bias_ref, o_ref, m_sc, l_sc, acc_sc):
    ki = pl.program_id(3)
    n_rep, tq, D = q_ref.shape[1], q_ref.shape[2], q_ref.shape[3]

    @pl.when(ki == 0)
    def _():
        m_sc[...] = jnp.full_like(m_sc, -jnp.inf)
        l_sc[...] = jnp.zeros_like(l_sc)
        acc_sc[...] = jnp.zeros_like(acc_sc)

    q = q_ref[0].reshape(n_rep * tq, D)   # all query heads of this kv group
    k = k_ref[0, 0]                       # (tkv, D)
    v = v_ref[0, 0]

    s = jax.lax.dot_general(q, k, (((1,), (1,)), ((), ())),
                            preferred_element_type=jnp.float32)   # (n_rep*tq, tkv)
    s = s + bias_ref[0]                   # additive key-padding bias (0 / -1e9)

    m_prev = m_sc[...]
    m_new = jnp.maximum(m_prev, jnp.max(s, axis=-1, keepdims=True))
    alpha = jnp.exp(m_prev - m_new)
    p = jnp.exp(s - m_new)
    l_sc[...] = alpha * l_sc[...] + jnp.sum(p, axis=-1, keepdims=True)
    acc_sc[...] = alpha * acc_sc[...] + jnp.dot(
        p.astype(v.dtype), v, preferred_element_type=jnp.float32)
    m_sc[...] = m_new

    @pl.when(ki == pl.num_programs(3) - 1)
    def _():
        out = acc_sc[...] * pl.reciprocal(l_sc[...], approx=False)
        for r in range(n_rep):            # static
            o_ref[0, r] = out[r * tq:(r + 1) * tq].astype(o_ref.dtype)


def flash_attention(q, k, v, bias, n_rep, *, tq=256, tkv=512):
    """q: (B,H,Sq,D), k/v: (B,Hkv,Sk,D), bias: (B,1,Sk) f32 -> (B,H,Sq,D)."""
    B, H, Sq, D = q.shape
    _, Hkv, Sk, _ = k.shape
    assert H == Hkv * n_rep
    tq = _tile(Sq, tq, 8)
    tkv = _tile(Sk, tkv, 128)
    grid = (B, Hkv, Sq // tq, Sk // tkv)
    q_spec = pl.BlockSpec((1, n_rep, tq, D), lambda b, h, qi, ki: (b, h, qi, 0))
    kv_spec = pl.BlockSpec((1, 1, tkv, D), lambda b, h, qi, ki: (b, h, ki, 0))
    o_spec = pl.BlockSpec((1, n_rep, tq, D), lambda b, h, qi, ki: (b, h, qi, 0))
    return pl.pallas_call(
        _flash_attn_kernel,
        out_shape=jax.ShapeDtypeStruct((B, H, Sq, D), q.dtype),
        grid=grid,
        in_specs=[
            q_spec,
            kv_spec,
            kv_spec,
            pl.BlockSpec((1, 1, tkv), lambda b, h, qi, ki: (b, 0, ki)),
        ],
        out_specs=o_spec,
        scratch_shapes=[
            pltpu.VMEM((n_rep * tq, 1), jnp.float32),   # running max m
            pltpu.VMEM((n_rep * tq, 1), jnp.float32),   # running sum l
            pltpu.VMEM((n_rep * tq, D), jnp.float32),   # f32 output accumulator
        ],
        compiler_params=pltpu.CompilerParams(
            dimension_semantics=("parallel", "parallel", "parallel", "arbitrary"),
            vmem_limit_bytes=VMEM_LIMIT,
        ),
    )(q, k, v, bias)


# ---------------------------------------------------------------------------
# Module wrapper: parameter setup + tiny glue (RoPE table gather, mask bias)
# ---------------------------------------------------------------------------
class MistralAttentionPallas:
    def __init__(self, hidden_size, num_attention_heads, num_key_value_heads,
                 max_position_embeddings=32, rope_theta=10000.0, key=None,
                 dtype=jnp.float32):
        self.embed_dim = hidden_size
        self.n_heads = num_attention_heads
        self.head_dim = hidden_size // num_attention_heads
        self.num_kv_heads = num_key_value_heads
        self.n_rep = self.n_heads // self.num_kv_heads
        self.dtype = dtype

        E, H, D, Hkv = self.embed_dim, self.n_heads, self.head_dim, self.num_kv_heads
        if key is None:
            key = jax.random.PRNGKey(0)
        k1, k2, k3, k4 = jax.random.split(key, 4)
        init = 0.02
        # 2D weights stored as [in_features, out_features] (== torch Linear weight.T)
        self.wq = (jax.random.normal(k1, (E, H * D)) * init).astype(dtype)
        self.wk = (jax.random.normal(k2, (E, Hkv * D)) * init).astype(dtype)
        self.wv = (jax.random.normal(k3, (E, Hkv * D)) * init).astype(dtype)
        self.wo = (jax.random.normal(k4, (H * D, E)) * init).astype(dtype)

        # Head-group factors: target G*D ~ 512 output columns per MXU step.
        self.g_q = _largest_divisor(H, max(1, 512 // D))
        self.g_kv = _largest_divisor(Hkv, max(1, 512 // D))

        # Grouped per-head weight layouts (one-time at init).  The softmax
        # scale 1/sqrt(D) is folded into the q weights so q and k share the
        # same unscaled RoPE tables and no score-tile scaling is ever needed.
        scale = 1.0 / math.sqrt(D)
        self.wq_g = _group_heads(self.wq * scale, H, D, self.g_q)    # (H/G,  E, G*D)
        self.wk_g = _group_heads(self.wk, Hkv, D, self.g_kv)         # (Hkv/G,E, G*D)
        self.wv_g = _group_heads(self.wv, Hkv, D, self.g_kv)
        self.wo_h = self.wo.reshape(H, D, E)                          # (H, D, E)

        # MistralRotaryEmbedding cos/sin cache (+ sign-folded sin for the
        # roll-based rotate_half inside the projection epilogue).
        inv_freq = 1.0 / (rope_theta ** (jnp.arange(0, D, 2, dtype=jnp.float32) / D))
        t = jnp.arange(max_position_embeddings, dtype=jnp.float32)
        freqs = jnp.einsum("i,j->ij", t, inv_freq)
        emb = jnp.concatenate([freqs, freqs], axis=-1)
        self.cos_cached = jnp.cos(emb).astype(dtype)                  # (max_pos, D)
        self.sin_cached = jnp.sin(emb).astype(dtype)
        self.sin_folded = jnp.concatenate(
            [-jnp.sin(freqs), jnp.sin(freqs)], axis=-1).astype(dtype)

    def __call__(self, query, key, value, position_ids, src_mask):
        D = self.head_dim
        # Tiny glue gathers; rotation + scale are fused into the projections.
        cos = self.cos_cached[position_ids]      # (B, S, D)
        sinf = self.sin_folded[position_ids]

        q = head_proj(query, self.wq_g, cos, sinf, head_dim=D)   # (B, H,   S, D)
        k = head_proj(key, self.wk_g, cos, sinf, head_dim=D)     # (B, Hkv, S, D)
        v = head_proj(value, self.wv_g, head_dim=D)              # (B, Hkv, S, D)

        # Additive key-padding bias (0 / -1e9), computed once in the wrapper.
        bias = jnp.where(src_mask == 0, -1e9, 0.0).astype(jnp.float32)[:, None, :]

        attn = flash_attention(q, k, v, bias, self.n_rep)        # (B, H, S, D)
        return out_proj(attn, self.wo_h)                         # (B, S, E)


# ---------------------------------------------------------------------------
# Pure-JAX reference (mirrors the PyTorch forward semantics) for verification
# ---------------------------------------------------------------------------
def reference_forward(m, query, key, value, position_ids, src_mask):
    B, S, E = query.shape
    H, D, Hkv = m.n_heads, m.head_dim, m.num_kv_heads
    q = (query.reshape(B * S, E) @ m.wq).reshape(B, S, H, D).transpose(0, 2, 1, 3)
    k = (key.reshape(B * S, E) @ m.wk).reshape(B, S, Hkv, D).transpose(0, 2, 1, 3)
    v = (value.reshape(B * S, E) @ m.wv).reshape(B, S, Hkv, D).transpose(0, 2, 1, 3)
    cos = m.cos_cached[position_ids][:, None]   # (B, 1, S, D)
    sin = m.sin_cached[position_ids][:, None]

    def rot_half(x):
        return jnp.concatenate([-x[..., D // 2:], x[..., : D // 2]], axis=-1)

    q = q * cos + rot_half(q) * sin
    k = k * cos + rot_half(k) * sin
    k = jnp.repeat(k, m.n_rep, axis=1)
    v = jnp.repeat(v, m.n_rep, axis=1)
    scores = jnp.einsum("bhqd,bhkd->bhqk", q, k) / math.sqrt(D)
    scores = jnp.where(src_mask[:, None, None, :] == 0, -1e9, scores)
    p = jax.nn.softmax(scores, axis=-1)
    x = jnp.einsum("bhqk,bhkd->bhqd", p, v)
    x = x.transpose(0, 2, 1, 3).reshape(B * S, H * D)
    return (x @ m.wo).reshape(B, S, E)


if __name__ == "__main__":
    B, S, E = 2, 8, 32        # batch, seq, hidden
    H, Hkv = 4, 2             # attention heads, key/value heads (GQA, n_rep=2)

    root = jax.random.PRNGKey(0)
    kq, kk, kv_, kparam = jax.random.split(root, 4)

    module = MistralAttentionPallas(
        hidden_size=E,
        num_attention_heads=H,
        num_key_value_heads=Hkv,
        max_position_embeddings=32,
        rope_theta=10000.0,
        key=kparam,
    )

    query = jax.random.normal(kq, (B, S, E), jnp.float32)
    key_in = jax.random.normal(kk, (B, S, E), jnp.float32)
    value = jax.random.normal(kv_, (B, S, E), jnp.float32)
    position_ids = jnp.broadcast_to(jnp.arange(S, dtype=jnp.int32), (B, S))
    src_mask = jnp.ones((B, S), jnp.int32).at[1, -2:].set(0)  # mask last 2 keys of batch 1

    out = module(query, key_in, value, position_ids, src_mask)
    out = jax.block_until_ready(out)

    ref = reference_forward(module, query, key_in, value, position_ids, src_mask)
    np.testing.assert_allclose(np.asarray(out), np.asarray(ref), rtol=2e-2, atol=1e-3)

    print("KERNEL_OK")
</pallas_src>

<mosaic_0001>
module attributes {stable_mosaic.version = 11 : i64} {
  func.func @_head_proj_rope_kernel(%arg0: i32, %arg1: i32, %arg2: i32, %arg3: i32, %arg4: memref<1x8x32xf32, #tpu.memory_space<vmem>>, %arg5: memref<1x32x32xf32, #tpu.memory_space<vmem>>, %arg6: memref<1x8x8xf32, #tpu.memory_space<vmem>>, %arg7: memref<1x8x8xf32, #tpu.memory_space<vmem>>, %arg8: memref<1x4x8x8xf32, #tpu.memory_space<vmem>>, %arg9: memref<8x32xf32, #tpu.memory_space<vmem>>) attributes {dimension_semantics = [#tpu.dimension_semantics<parallel>, #tpu.dimension_semantics<parallel>, #tpu.dimension_semantics<parallel>, #tpu.dimension_semantics<arbitrary>], iteration_bounds = array<i64: 2, 1, 1, 1>, scalar_prefetch = 0 : i64, scratch_operands = 1 : i64, tpu.core_type = #tpu.core_type<tc>, window_params = [{transform_indices = @transform_0, window_bounds = array<i64: 1, 8, 32>}, {transform_indices = @transform_1, window_bounds = array<i64: 1, 32, 32>}, {transform_indices = @transform_2, window_bounds = array<i64: 1, 8, 8>}, {transform_indices = @transform_3, window_bounds = array<i64: 1, 8, 8>}, {transform_indices = @transform_4, window_bounds = array<i64: 1, 4, 8, 8>}]} {
    %c0_i32 = arith.constant 0 : i32
    %0 = arith.cmpi eq, %arg3, %c0_i32 : i32
    %1 = arith.extui %0 : i1 to i32
    %c0_i32_0 = arith.constant 0 : i32
    %2 = arith.cmpi ne, %1, %c0_i32_0 : i32
    scf.if %2 {
      %cst_12 = arith.constant 0.000000e+00 : f32
      %14 = vector.broadcast %cst_12 : f32 to vector<8x32xf32>
      %c0_13 = arith.constant 0 : index
      %c0_14 = arith.constant 0 : index
      %15 = vector.load %arg9[%c0_13, %c0_14] : memref<8x32xf32, #tpu.memory_space<vmem>>, vector<8x32xf32>
      tpu.vector_store %arg9[%c0_13, %c0_14], %14 {strides = array<i32>} : memref<8x32xf32, #tpu.memory_space<vmem>>, vector<8x32xf32>,
    } else {
    }
    %c0 = arith.constant 0 : index
    %c0_1 = arith.constant 0 : index
    %3 = vector.load %arg9[%c0, %c0_1] : memref<8x32xf32, #tpu.memory_space<vmem>>, vector<8x32xf32>
    %c0_2 = arith.constant 0 : index
    %c0_3 = arith.constant 0 : index
    %c0_4 = arith.constant 0 : index
    %4 = vector.load %arg4[%c0_2, %c0_3, %c0_4] : memref<1x8x32xf32, #tpu.memory_space<vmem>>, vector<1x8x32xf32>
    %5 = vector.shape_cast %4 : vector<1x8x32xf32> to vector<8x32xf32>
    %c0_5 = arith.constant 0 : index
    %c0_6 = arith.constant 0 : index
    %c0_7 = arith.constant 0 : index
    %6 = vector.load %arg5[%c0_5, %c0_6, %c0_7] : memref<1x32x32xf32, #tpu.memory_space<vmem>>, vector<1x32x32xf32>
    %7 = vector.shape_cast %6 : vector<1x32x32xf32> to vector<32x32xf32>
    %cst = arith.constant dense<0.000000e+00> : vector<8x32xf32>
    %8 = tpu.matmul %5, %7, %cst {dimension_numbers = #tpu.dot_dimension_numbers<[1], [0], [0], [1], [0, 0, 1, 1], [], []>} : vector<8x32xf32>, vector<32x32xf32>, vector<8x32xf32> -> vector<8x32xf32>
    %9 = arith.addf %3, %8 : vector<8x32xf32>
    %c0_8 = arith.constant 0 : index
    %c0_9 = arith.constant 0 : index
    %10 = vector.load %arg9[%c0_8, %c0_9] : memref<8x32xf32, #tpu.memory_space<vmem>>, vector<8x32xf32>
    tpu.vector_store %arg9[%c0_8, %c0_9], %9 {strides = array<i32>} : memref<8x32xf32, #tpu.memory_space<vmem>>, vector<8x32xf32>,
    %c0_i32_10 = arith.constant 0 : i32
    %11 = arith.cmpi eq, %arg3, %c0_i32_10 : i32
    %12 = arith.extui %11 : i1 to i32
    %c0_i32_11 = arith.constant 0 : i32
    %13 = arith.cmpi ne, %12, %c0_i32_11 : i32
    scf.if %13 {
      %c0_12 = arith.constant 0 : index
      %c0_13 = arith.constant 0 : index
      %14 = vector.load %arg9[%c0_12, %c0_13] : memref<8x32xf32, #tpu.memory_space<vmem>>, vector<8x32xf32>
      %c0_14 = arith.constant 0 : index
      %c0_15 = arith.constant 0 : index
      %c0_16 = arith.constant 0 : index
      %15 = vector.load %arg6[%c0_14, %c0_15, %c0_16] : memref<1x8x8xf32, #tpu.memory_space<vmem>>, vector<1x8x8xf32>
      %16 = vector.shape_cast %15 : vector<1x8x8xf32> to vector<8x8xf32>
      %c0_17 = arith.constant 0 : index
      %c0_18 = arith.constant 0 : index
      %c0_19 = arith.constant 0 : index
      %17 = vector.load %arg7[%c0_17, %c0_18, %c0_19] : memref<1x8x8xf32, #tpu.memory_space<vmem>>, vector<1x8x8xf32>
      %18 = vector.shape_cast %17 : vector<1x8x8xf32> to vector<8x8xf32>
      %19 = vector.extract_strided_slice %14 {offsets = [0, 0], sizes = [8, 8], strides = [1, 1]} : vector<8x32xf32> to vector<8x8xf32>
      %20 = vector.extract_strided_slice %19 {offsets = [0, 4], sizes = [8, 4], strides = [1, 1]} : vector<8x8xf32> to vector<8x4xf32>
      %21 = vector.extract_strided_slice %19 {offsets = [0, 0], sizes = [8, 4], strides = [1, 1]} : vector<8x8xf32> to vector<8x4xf32>
      %22 = tpu.concatenate %20, %21 in 1 : vector<8x4xf32>, vector<8x4xf32> -> vector<8x8xf32>
      %23 = arith.mulf %19, %16 : vector<8x8xf32>
      %24 = arith.mulf %22, %18 : vector<8x8xf32>
      %25 = arith.addf %23, %24 : vector<8x8xf32>
      %c0_20 = arith.constant 0 : index
      %c0_21 = arith.constant 0 : index
      %c0_22 = arith.constant 0 : index
      %c0_23 = arith.constant 0 : index
      %26 = vector.load %arg8[%c0_20, %c0_21, %c0_22, %c0_23] : memref<1x4x8x8xf32, #tpu.memory_space<vmem>>, vector<1x1x8x8xf32>
      %27 = vector.shape_cast %26 : vector<1x1x8x8xf32> to vector<8x8xf32>
      %28 = vector.shape_cast %25 : vector<8x8xf32> to vector<1x1x8x8xf32>
      tpu.vector_store %arg8[%c0_20, %c0_21, %c0_22, %c0_23], %28 {strides = array<i32>} : memref<1x4x8x8xf32, #tpu.memory_space<vmem>>, vector<1x1x8x8xf32>,
      %29 = vector.extract_strided_slice %14 {offsets = [0, 8], sizes = [8, 8], strides = [1, 1]} : vector<8x32xf32> to vector<8x8xf32>
      %30 = vector.extract_strided_slice %29 {offsets = [0, 4], sizes = [8, 4], strides = [1, 1]} : vector<8x8xf32> to vector<8x4xf32>
      %31 = vector.extract_strided_slice %29 {offsets = [0, 0], sizes = [8, 4], strides = [1, 1]} : vector<8x8xf32> to vector<8x4xf32>
      %32 = tpu.concatenate %30, %31 in 1 : vector<8x4xf32>, vector<8x4xf32> -> vector<8x8xf32>
      %33 = arith.mulf %29, %16 : vector<8x8xf32>
      %34 = arith.mulf %32, %18 : vector<8x8xf32>
      %35 = arith.addf %33, %34 : vector<8x8xf32>
      %c0_24 = arith.constant 0 : index
      %c1 = arith.constant 1 : index
      %c0_25 = arith.constant 0 : index
      %c0_26 = arith.constant 0 : index
      %36 = vector.load %arg8[%c0_24, %c1, %c0_25, %c0_26] : memref<1x4x8x8xf32, #tpu.memory_space<vmem>>, vector<1x1x8x8xf32>
      %37 = vector.shape_cast %36 : vector<1x1x8x8xf32> to vector<8x8xf32>
      %38 = vector.shape_cast %35 : vector<8x8xf32> to vector<1x1x8x8xf32>
      tpu.vector_store %arg8[%c0_24, %c1, %c0_25, %c0_26], %38 {strides = array<i32>} : memref<1x4x8x8xf32, #tpu.memory_space<vmem>>, vector<1x1x8x8xf32>,
      %39 = vector.extract_strided_slice %14 {offsets = [0, 16], sizes = [8, 8], strides = [1, 1]} : vector<8x32xf32> to vector<8x8xf32>
      %40 = vector.extract_strided_slice %39 {offsets = [0, 4], sizes = [8, 4], strides = [1, 1]} : vector<8x8xf32> to vector<8x4xf32>
      %41 = vector.extract_strided_slice %39 {offsets = [0, 0], sizes = [8, 4], strides = [1, 1]} : vector<8x8xf32> to vector<8x4xf32>
      %42 = tpu.concatenate %40, %41 in 1 : vector<8x4xf32>, vector<8x4xf32> -> vector<8x8xf32>
      %43 = arith.mulf %39, %16 : vector<8x8xf32>
      %44 = arith.mulf %42, %18 : vector<8x8xf32>
      %45 = arith.addf %43, %44 : vector<8x8xf32>
      %c0_27 = arith.constant 0 : index
      %c2 = arith.constant 2 : index
      %c0_28 = arith.constant 0 : index
      %c0_29 = arith.constant 0 : index
      %46 = vector.load %arg8[%c0_27, %c2, %c0_28, %c0_29] : memref<1x4x8x8xf32, #tpu.memory_space<vmem>>, vector<1x1x8x8xf32>
      %47 = vector.shape_cast %46 : vector<1x1x8x8xf32> to vector<8x8xf32>
      %48 = vector.shape_cast %45 : vector<8x8xf32> to vector<1x1x8x8xf32>
      tpu.vector_store %arg8[%c0_27, %c2, %c0_28, %c0_29], %48 {strides = array<i32>} : memref<1x4x8x8xf32, #tpu.memory_space<vmem>>, vector<1x1x8x8xf32>,
      %49 = vector.extract_strided_slice %14 {offsets = [0, 24], sizes = [8, 8], strides = [1, 1]} : vector<8x32xf32> to vector<8x8xf32>
      %50 = vector.extract_strided_slice %49 {offsets = [0, 4], sizes = [8, 4], strides = [1, 1]} : vector<8x8xf32> to vector<8x4xf32>
      %51 = vector.extract_strided_slice %49 {offsets = [0, 0], sizes = [8, 4], strides = [1, 1]} : vector<8x8xf32> to vector<8x4xf32>
      %52 = tpu.concatenate %50, %51 in 1 : vector<8x4xf32>, vector<8x4xf32> -> vector<8x8xf32>
      %53 = arith.mulf %49, %16 : vector<8x8xf32>
      %54 = arith.mulf %52, %18 : vector<8x8xf32>
      %55 = arith.addf %53, %54 : vector<8x8xf32>
      %c0_30 = arith.constant 0 : index
      %c3 = arith.constant 3 : index
      %c0_31 = arith.constant 0 : index
      %c0_32 = arith.constant 0 : index
      %56 = vector.load %arg8[%c0_30, %c3, %c0_31, %c0_32] : memref<1x4x8x8xf32, #tpu.memory_space<vmem>>, vector<1x1x8x8xf32>
      %57 = vector.shape_cast %56 : vector<1x1x8x8xf32> to vector<8x8xf32>
      %58 = vector.shape_cast %55 : vector<8x8xf32> to vector<1x1x8x8xf32>
      tpu.vector_store %arg8[%c0_30, %c3, %c0_31, %c0_32], %58 {strides = array<i32>} : memref<1x4x8x8xf32, #tpu.memory_space<vmem>>, vector<1x1x8x8xf32>,
    } else {
    }
    return
  }
  func.func @transform_0(%arg0: i32, %arg1: i32, %arg2: i32, %arg3: i32) -> (i32, i32, i32) {
    %c0_i32 = arith.constant 0 : i32
    return %arg0, %arg2, %arg3 : i32, i32, i32
  }
  func.func @transform_1(%arg0: i32, %arg1: i32, %arg2: i32, %arg3: i32) -> (i32, i32, i32) {
    %c0_i32 = arith.constant 0 : i32
    %c0_i32_0 = arith.constant 0 : i32
    return %arg1, %arg3, %c0_i32 : i32, i32, i32
  }
  func.func @transform_2(%arg0: i32, %arg1: i32, %arg2: i32, %arg3: i32) -> (i32, i32, i32) {
    %c0_i32 = arith.constant 0 : i32
    %c0_i32_0 = arith.constant 0 : i32
    return %arg0, %arg2, %c0_i32 : i32, i32, i32
  }
  func.func @transform_3(%arg0: i32, %arg1: i32, %arg2: i32, %arg3: i32) -> (i32, i32, i32) {
    %c0_i32 = arith.constant 0 : i32
    %c0_i32_0 = arith.constant 0 : i32
    return %arg0, %arg2, %c0_i32 : i32, i32, i32
  }
  func.func @transform_4(%arg0: i32, %arg1: i32, %arg2: i32, %arg3: i32) -> (i32, i32, i32, i32) {
    %c0_i32 = arith.constant 0 : i32
    %c0_i32_0 = arith.constant 0 : i32
    return %arg0, %arg1, %arg2, %c0_i32 : i32, i32, i32, i32
  }
}

</mosaic_0001>

<bundles_post_ra>
// kernel: tpu_custom_call.1
= control target key start
LH: loop header
LB: loop body
LE: loop exit
PB: predicated region body
PF: predicated region fallthrough
CT: control target
= control target key end

     0   :  { %s1401_s0 = inlined_call_operand.hbm [shape: f32[2,8,32], index: 0, kind: input, shape index: {}]   ;;  %s1402_s1 = inlined_call_operand.hbm [shape: f32[1,32,32], index: 1, kind: input, shape index: {}]   ;;  %s1403_s2 = inlined_call_operand.hbm [shape: f32[2,8,8], index: 2, kind: input, shape index: {}]   ;;  %s1404_s3 = inlined_call_operand.hbm [shape: f32[2,8,8], index: 3, kind: input, shape index: {}]   ;;  %s1405_s4 = inlined_call_operand.hbm [shape: f32[2,4,8,8], index: 4, kind: output, shape index: {}]  }
   0x1   :  { %1417 = sst [smem:[#allocation17_spill]] %s1401_s0 }
   0x2   :  { %1418 = sst [smem:[#allocation18_spill]] %s1403_s2 }
   0x3   :  { %9 = vsyncpa [#allocation4], 0 }
   0x4   :  { %11 = vsyncpa [#allocation4 + $0x1], 0 }
   0x5   :  { %12 = vsyncpa [#allocation7], 0 }
   0x6   :  { %13 = vsyncpa [#allocation5], 0 }
   0x7   :  { %15 = vsyncpa [#allocation5 + $0x1], 0  ;;  %s1094_s15 = smov 0   ;;  %s1096_s16 = smov 0  }
   0x8   :  { %s1098_s17 = smov 0   ;;  %s1100_s18 = smov 0  }
   0x9   :  { %s1102_s19 = smov 0   ;;  %s1104_s20 = smov 0  }
   0xa LB: > { %1419 = sst [smem:[#allocation15_spill]] %s1041_s19  ;;  %s47_s21 = sadd.s32 1, %s1041_s19  ;;  %s1045_s20 = sphi %s1104_s20, %s21_s20   ;;  %s1041_s19 = sphi %s1102_s19, %s1442_s19   ;;  %s1037_s18 = sphi %s1100_s18, %s1441_s18   ;;  %s1033_s17 = sphi %s1098_s17, %s1445_s17   ;;  %s1029_s16 = sphi %s1096_s16, %s1444_s16   ;;  %s1025_s15 = sphi %s1094_s15, %s1443_s15  }
   0xb   : > { %s58_s22 = sadd.s32 1, %s1033_s17  ;;  %p49_p0 = scmp.ge.s32.totalorder %s47_s21, 2 }
   0xc   : > { %p1406_p1 = scmp.ne.s32.totalorder %s1033_s17, %s1029_s16  ;;  %p66_p2 = scmp.eq.s32.totalorder %s1045_s20, 0 }
   0xd   : > { %s1447_s21 = smov (%p49_p0, %s47_s21), 0  ;;  %p768_p5 = scmp.lt.s32.totalorder %s1045_s20, 2 }
   0xe   : > { %1420 = sst [smem:[#allocation16_spill]] %s1447_s21  ;;  %p67_p4 = por %p66_p2, %p1406_p1 }
   0xf   : > { %s51_s23 = ssub.s32 %s1041_s19, %s1447_s21  ;;  %s227_s24 = sand.u32 1, %s1045_s20  }
  0x10   : > { %p56_p6 = scmp.eq.s32.totalorder %s51_s23, 0  ;;  %s229_s25 = sand.u32 1, %s1033_s17  }
  0x11   : > { %s1141_s26 = sshll.u32 %s1041_s19, 7  ;;  %s1146_s28 = sshll.u32 %s229_s25, 3 }
  0x12   : > { %s1144_s27 = scalar_select %p56_p6, %s1033_s17, %s58_s22  }
  0x13   : > { %s1421_s0 = sld [smem:[#allocation17_spill]]  ;;  %p1154_p7 = pnand %p768_p5, %p67_p4 }
  0x14   : > { %s231_s7 = scalar_lea.vmem [#allocation3], %s1146_s28  ;;  %s1161_s9 = scalar_lea.sflag [#allocation4], %s227_s24 }
  0x15   : > { %s1422_s6 = scalar_select %p1154_p7, 1, 0 }
  0x16   : > { %s240_s8 = sshll.u32 %s231_s7, 4  ;;  %p1167_p9 = pneg %p1154_p7  ;;  %s1159_s8 = int_to_ptr.vmem [resolvable:$true] %s240_s8 }
  0x18   : > { %s1423_s11 = scalar_select %p1167_p9, 1, 0 }
  0x19   : > { %s1152_s5 = scalar_lea.hbm %s1421_s0, %s1141_s26  ;;  %s842_s14 = scalar_lea.hbm %s1421_s0, 256 }
  0x1a   : > { %s837_s10 = scalar_lea.hbm %s1152_s5, 128  ;;  %p843_p12 = scmp.lt.u32.totalorder %s1152_s5, %s1421_s0 }
  0x1b   : > { %p838_p8 = scmp.ne.s32.totalorder %s1152_s5, %s837_s10  ;;  %p844_p13 = scmp.lt.u32.totalorder %s842_s14, %s837_s10 }
  0x1c   : > { %p846_p2 = scmp.lt.u32.totalorder %s837_s10, %s1152_s5 }
  0x1d   : > { %p840_p10 = pnand %p1167_p9, %p838_p8  ;;  %p845_p0 = por %p844_p13, %p843_p12 }
  0x1f   : > { %p841_p11 = pneg %p840_p10  ;;  %p847_p4 = por %p846_p2, %p845_p0 }
  0x21   : > { %p848_p5 = pnand %p847_p4, %p841_p11 }
  0x23   : > { %851 = shalt.err (!%p848_p5)
}
  0x24   : > { %s852_s24 = scalar_lea.vmem %s1159_s8, 128  ;;  %s1047_s25 = smov [#allocation3]  }
  0x25   : > { %p853_p6 = scmp.ne.s32.totalorder %s1159_s8, %s852_s24  ;;  %s857_s29 = sshll.u32 %s1047_s25, 4  ;;  %s858_s29 = int_to_ptr.vmem [resolvable:$false] %s857_s29 }
  0x26   : > { %s859_s30 = scalar_lea.vmem %s858_s29, 256  ;;  %p860_p3 = scmp.lt.s32.totalorder %s1159_s8, %s858_s29 }
  0x27   : > { %p855_p8 = pnand %p853_p6, %p1167_p9  ;;  %p861_p1 = scmp.lt.s32.totalorder %s859_s30, %s852_s24 }
  0x29   : > { %p856_p10 = pneg %p855_p8  ;;  %p862_p12 = por %p861_p1, %p860_p3 }
  0x2b   : > { %p863_p13 = pnand %p862_p12, %p856_p10 }
  0x2d   : > { %866 = shalt.err (!%p863_p13)
}
  0x2e   : > { %756 = dma.hbm_to_vmem [thread:$0]  (!%p1154_p7), %s1152_s5, 128, %s1159_s8, %s1161_s9  }
  0x2f   : > { %s1424_s2 = sld [smem:[#allocation18_spill]]  ;;  %s251_s13 = scalar_lea.vmem [#allocation8], %s1146_s28 }
  0x30   : > { %s259_s14 = sshll.u32 %s251_s13, 4  ;;  %s260_s14 = int_to_ptr.vmem [resolvable:$true] %s259_s14 }
  0x35   : > { %s1195_s12 = scalar_lea.hbm %s1424_s2, %s1141_s26  ;;  %s872_s5 = scalar_lea.hbm %s1424_s2, 256 }
  0x36   : > { %s867_s22 = scalar_lea.hbm %s1195_s12, 128  ;;  %p873_p0 = scmp.lt.u32.totalorder %s1195_s12, %s1424_s2 }
  0x37   : > { %p868_p1 = scmp.ne.s32.totalorder %s1195_s12, %s867_s22  ;;  %p874_p2 = scmp.lt.u32.totalorder %s872_s5, %s867_s22 }
  0x38   : > { %p876_p5 = scmp.lt.u32.totalorder %s867_s22, %s1195_s12 }
  0x39   : > { %p870_p3 = pnand %p868_p1, %p1167_p9  ;;  %p875_p4 = por %p874_p2, %p873_p0 }
  0x3b   : > { %p871_p11 = pneg %p870_p3  ;;  %p877_p6 = por %p876_p5, %p875_p4 }
  0x3d   : > { %p878_p8 = pnand %p877_p6, %p871_p11 }
  0x3f   : > { %881 = shalt.err (!%p878_p8)
}
  0x40   : > { %s882_s29 = scalar_lea.vmem %s260_s14, 128  ;;  %s1048_s30 = smov [#allocation8]  }
  0x41   : > { %p883_p10 = scmp.ne.s32.totalorder %s260_s14, %s882_s29  ;;  %s887_s7 = sshll.u32 %s1048_s30, 4  ;;  %s888_s7 = int_to_ptr.vmem [resolvable:$false] %s887_s7 }
  0x42   : > { %s889_s10 = scalar_lea.vmem %s888_s7, 256  ;;  %p890_p1 = scmp.lt.s32.totalorder %s260_s14, %s888_s7 }
  0x43   : > { %p885_p12 = pnand %p883_p10, %p1167_p9  ;;  %p891_p3 = scmp.lt.s32.totalorder %s889_s10, %s882_s29 }
  0x45   : > { %p886_p13 = pneg %p885_p12  ;;  %p892_p7 = por %p891_p3, %p890_p1 }
  0x47   : > { %p893_p0 = pnand %p892_p7, %p886_p13 }
  0x49   : > { %896 = shalt.err (!%p893_p0)
}
  0x4a   : > { %p1425_p2 = scmp.ne.s32.totalorder %s1422_s6, 0  ;;  %s1217_s13 = sadd.s32 4294967295, %s1045_s20  }
  0x4b   : > { %s689_s22 = sadd.s32 4294967294, %s1045_s20   ;;  %p71_p7 = scmp.ne.s32.totalorder %s1029_s16, %s1025_s15 }
  0x4c   : > { %759 = dma.hbm_to_vmem [thread:$0]  (!%p1425_p2), %s1195_s12, 128, %s260_s14, %s1161_s9  }
  0x4d   : > { %p1411_p11 = scmp.eq.s32.totalorder %s1217_s13, 0  ;;  %p183_p4 = scmp.eq.s32.totalorder %s1217_s13, 1 }
  0x4e   : > { %p189_p5 = scmp.eq.s32.totalorder %s689_s22, 1  ;;  %p690_p6 = scmp.ge.s32.totalorder %s1045_s20, 1 }
  0x4f   : > { %p1227_p8 = por %p1411_p11, %p71_p7  ;;  %p1427_p10 = scmp.ne.s32.totalorder %s1033_s17, %s1029_s16 }
  0x50   : > { %p1238_p13 = por %p189_p5, %p71_p7  ;;  %p196_p1 = scmp.lt.s32.totalorder %s1045_s20, 3 }
  0x51   : > { %s1426_s23 = scalar_select %p1227_p8, 1, 0 }
  0x52   : > { %p1234_p12 = por %p183_p4, %p1427_p10  ;;  %p1243_p3 = pnand %p690_p6, %p196_p1 }
  0x53   : > { %s1429_s14 = scalar_select %p1238_p13, 1, 0 }
  0x54   : > { %s1428_s12 = scalar_select %p1234_p12, 1, 0 }
  0x55   : > { %s1430_s24 = scalar_select %p1243_p3, 1, 0 }
  0x56   : > { %s1049_s5 = smov [#allocation6]   ;;  %p749_p0 = pneg %p1243_p3 }
  0x57   : > { %s213_s8 = sshll.u32 %s1049_s5, 4  ;;  %s270_s29 = scalar_lea.vmem [#allocation9], %s1146_s28  ;;  %s1247_s8 = int_to_ptr.vmem [resolvable:$true] %s213_s8 }
  0x58   : > { %p1253_p4 = pnand %p749_p0, %p1411_p11  ;;  %s278_s30 = sshll.u32 %s270_s29, 4  ;;  %s1264_s30 = int_to_ptr.vmem [resolvable:$true] %s278_s30 }
  0x59   : > { %s1262_s22 = scalar_lea.hbm %s1404_s3, %s1141_s26  ;;  %s897_s2 = scalar_lea.hbm %s1402_s1, 512 }
  0x5a   : > { %p898_p7 = scmp.ne.s32.totalorder %s1402_s1, %s897_s2  ;;  %p899_p5 = pneg %p1253_p4 }
  0x5b   : > { %p904_p1 = scmp.lt.u32.totalorder %s897_s2, %s1402_s1 }
  0x5c   : > { %p900_p6 = pnand %p899_p5, %p898_p7 }
  0x5e   : > { %p901_p10 = pneg %p900_p6 }
  0x60   : > { %p906_p0 = pnand %p904_p1, %p901_p10 }
  0x62   : > { %909 = shalt.err (!%p906_p0)
}
  0x63   : > { %s910_s26 = scalar_lea.vmem %s1247_s8, 512  ;;  %p918_p8 = scmp.lt.s32.totalorder %s1247_s8, %s1247_s8 }
  0x64   : > { %p911_p11 = scmp.ne.s32.totalorder %s1247_s8, %s910_s26  ;;  %p919_p3 = scmp.lt.s32.totalorder %s910_s26, %s910_s26 }
  0x66   : > { %p913_p13 = pnand %p911_p11, %p899_p5  ;;  %p920_p2 = por %p919_p3, %p918_p8 }
  0x68   : > { %p914_p12 = pneg %p913_p13 }
  0x6a   : > { %p921_p9 = pnand %p920_p2, %p914_p12 }
  0x6c   : > { %924 = shalt.err (!%p921_p9)
}
  0x6d   : > { %s1050_s0 = smov 128   ;;  %s1051_s2 = smov 8  }
  0x6e   : > { %752 = dma.hbm_to_vmem [thread:$0]  (!%p1253_p4), %s1402_s1, 512, %s1247_s8, [#allocation7], %s1050_s0, %s1050_s0, %s1051_s2  }
  0x6f   : > { %s925_s7 = scalar_lea.hbm %s1262_s22, 128  ;;  %p1432_p13 = scmp.ne.s32.totalorder %s1423_s11, 0 }
  0x70   : > { %p926_p11 = scmp.ne.s32.totalorder %s1262_s22, %s925_s7  ;;  %s930_s28 = scalar_lea.hbm %s1404_s3, 256 }
  0x71   : > { %p931_p9 = scmp.lt.u32.totalorder %s1262_s22, %s1404_s3  ;;  %p932_p12 = scmp.lt.u32.totalorder %s930_s28, %s925_s7 }
  0x72   : > { %p928_p8 = pnand %p926_p11, %p1432_p13  ;;  %p934_p7 = scmp.lt.u32.totalorder %s925_s7, %s1262_s22 }
  0x73   : > { %p933_p3 = por %p932_p12, %p931_p9 }
  0x74   : > { %p929_p2 = pneg %p928_p8 }
  0x75   : > { %p935_p5 = por %p934_p7, %p933_p3 }
  0x77   : > { %p936_p6 = pnand %p935_p5, %p929_p2 }
  0x79   : > { %939 = shalt.err (!%p936_p6)
}
  0x7a   : > { %s940_s8 = scalar_lea.vmem %s1264_s30, 128  ;;  %s1052_s25 = smov [#allocation9]  }
  0x7b   : > { %p941_p4 = scmp.ne.s32.totalorder %s1264_s30, %s940_s8  ;;  %s945_s0 = sshll.u32 %s1052_s25, 4  ;;  %s946_s0 = int_to_ptr.vmem [resolvable:$false] %s945_s0 }
  0x7c   : > { %s947_s2 = scalar_lea.vmem %s946_s0, 256  ;;  %p948_p0 = scmp.lt.s32.totalorder %s1264_s30, %s946_s0 }
  0x7d   : > { %p943_p10 = pnand %p941_p4, %p1432_p13  ;;  %p949_p11 = scmp.lt.s32.totalorder %s947_s2, %s940_s8 }
  0x7f   : > { %p944_p1 = pneg %p943_p10  ;;  %p950_p8 = por %p949_p11, %p948_p0 }
  0x81   : > { %p951_p9 = pnand %p950_p8, %p944_p1 }
  0x83   : > { %954 = shalt.err (!%p951_p9)
}
  0x84   : > { %p1433_p2 = scmp.ne.s32.totalorder %s1422_s6, 0  ;;  %p1434_p12 = scmp.ne.s32.totalorder %s1430_s24, 0 }
  0x85   : > { %s289_s11 = sand.u32 (!%p1434_p12), 1, %s1217_s13   ;;  %s1313_s19 = sand.u32 (!%p1434_p12), 1, %s1029_s16  }
  0x86   : > { %762 = dma.hbm_to_vmem [thread:$0]  (!%p1433_p2), %s1262_s22, 128, %s1264_s30, %s1161_s9  }
  0x87   : > { %287 = sbr.rel (%p1434_p12) target bundleno = 755 (0x2f3), region = 36  ;;  %s1316_s21 = sshll.u32 (!%p1434_p12), %s1313_s19, 3 }
  0x88   : > { %s290_s7 = scalar_lea.sflag (!%p1434_p12), [#allocation4], %s289_s11  ;;  %s293_s10 = scalar_lea.vmem (!%p1434_p12), [#allocation3], %s1316_s21 }
  0x89   : > { %p1435_p13 = scmp.ne.s32.totalorder (!%p1434_p12), %s1426_s23, 0 }
  0x8e   : > { %1008 = dma.done.wait (%p1435_p13), %s290_s7, 128  }
  0x8f   : > { %1010 = vsyncadd (%p1435_p13), %s290_s7, 4294967168  ;;  %p1436_p3 = scmp.eq.s32.totalorder %s1217_s13, 0 }
  0x91   : > { %1012 = dma.done.wait (%p1436_p3), [#allocation7], 512   ;;  %p1437_p7 = pmov %p1436_p3 }
  0x92   : > { %s306_s6 = scalar_lea.vmem [#allocation8], %s1316_s21 }
  0x93   : > { %1014 = vsyncadd (%p1437_p7), [#allocation7], 4294966784 }
  0x94   : > { %1016 = dma.done.wait (%p1435_p13), %s290_s7, 256  }
  0x95   : > { %1018 = vsyncadd (%p1435_p13), %s290_s7, 4294967040  ;;  %vm356_vm0 = vcmask 261120   ;;  %v1053_v0 = vmov 0.0|0.0   ;;  %v1054_v1 = vmov 0.0   ;;  %vm1055_vm1 = vmmov 0   ;;  %v360_v2 = vld [vmem:[#allocation6] sm:$0xff] }
  0x96   : > { %731 = vmatprep.subr.bf16.mxu0 %v1053_v0  ;;  %357 = vst.msk [vmem:[#allocation2] sm:$0xff] %vm356_vm0, %v1054_v1  ;;  %728 = vmatprep.mubr.msk.f32.mxu0 %vm1055_vm1, %v1054_v1  ;;  %v361_v3 = vld [vmem:[#allocation6 + $0x8] sm:$0xff]  ;;  %v362_v4 = vld [vmem:[#allocation6 + $0x10] sm:$0xff]  ;;  %v363_v6 = vld [vmem:[#allocation6 + $0x18] sm:$0xff]  ;;  %s1056_s9 = smov 108   ;;  %s1057_s13 = smov 124  }
  0x97   : > { %v732_v5 = vpack.c.bf16 %v361_v3, %v360_v2  ;;  %v735_v7 = vpack.c.bf16 %v363_v6, %v362_v4  ;;  %v359_v8 = vld [vmem:[%s293_s10] sm:$0xff]  ;;  %s1058_s23 = smov 100   ;;  %s1059_s24 = smov 116   ;;  %v444_v14 = vld [vmem:[%s306_s6] sm:$0xff]  ;;  %vm453_vm2 = vcmask 31744   ;;  %vm458_vm3 = vcmask 64512  }
  0x98   : > { %s1060_s30 = smov 16   ;;  %s1061_s22 = smov 8  }
  0x99   : > { %733 = vmatpush3.bf16.msra.mxu0 %v732_v5  ;;  %s1062_s5 = smov 24   ;;  %s315_s28 = scalar_lea.vmem [#allocation9], %s1316_s21 }
  0x9a   : > { %734 = vmatprep.subr.bf16.mxu0 %v1053_v0  ;;  %v445_v17 = vld [vmem:[%s315_s28] sm:$0xff]  ;;  %s1063_s29 = smov 4   ;;  %s1064_s26 = smov 120  }
  0x9b   : > { %s1065_s8 = smov 112   ;;  %s704_s25 = sshll.u32 %s1313_s19, 5 }
  0x9c   : > { %s1066_s0 = smov 104   ;;  %s349_s2 = scalar_lea.vmem [#allocation10], %s704_s25 }
  0x9d   : > { %736 = vmatpush3.bf16.msra.mxu0 %v735_v7  ;;  %v358_v9 = vld [vmem:[#allocation2] sm:$0xff]  ;;  %s538_s11 = sshll.u32 %s349_s2, 4  ;;  %s714_s21 = sshll.u32 %s1037_s18, 9  ;;  %s1346_s11 = int_to_ptr.vmem [resolvable:$true] %s538_s11 }
  0x9e   : > { %s1351_s6 = scalar_lea.hbm %s1405_s4, %s714_s21  ;;  %p1438_p6 = scmp.ne.s32.totalorder %s1428_s12, 0 }
  0x9f   : > { %s1067_s18 = smov [#allocation10]  }
  0xa0   : > { %729 = vmatmul.mubr.msk.f32.vlgmr.msra.gmra.mrb[0].mxu0 %vm356_vm0, %v359_v8 }
 0x173   : > { %v434_v10 = vpop.f32.mrb[0].mxu0 }
 0x174   : > { %v438_v11 = vadd.f32 %v434_v10, %v358_v9  ;;  %v730_v12 = vpop.f32.mrb[1].mxu0 }
 0x176   : > { %439 = vst.msk [vmem:[#allocation2] sm:$0xff] %vm356_vm0, %v438_v11 }
 0x17d   : > { %v443_v13 = vld [vmem:[#allocation2] sm:$0xff] }
 0x17e   : > { %481 = vrot.lane.b32.xlu1 %v443_v13, %s1056_s9  ;;  %447 = vrot.lane.b32.xlu0 %v443_v13, %s1057_s13  ;;  %v455_v40 = vmul.f32 %v444_v14, %v443_v13  ;;  %s522_s9 = scalar_lea.sflag [#allocation5], %s1313_s19  ;;  %s955_s13 = scalar_lea.vmem %s1346_s11, 512 }
 0x17f   : > { %p956_p5 = scmp.ne.s32.totalorder %s1346_s11, %s955_s13 }
 0x181   : > { %p957_p4 = pnand %p956_p5, %p1438_p6 }
 0x182   : > { %501 = vrot.lane.b32.xlu1 %v443_v13, %s1058_s23  ;;  %460 = vrot.lane.b32.xlu0 %v443_v13, %s1059_s24  ;;  %s959_s23 = sshll.u32 %s1067_s18, 4  ;;  %s960_s23 = int_to_ptr.vmem [resolvable:$false] %s959_s23 }
 0x183   : > { %p958_p10 = pneg %p957_p4  ;;  %s961_s24 = scalar_lea.vmem %s960_s23, 1024 }
 0x184   : > { %p962_p1 = scmp.lt.s32.totalorder %s1346_s11, %s960_s23  ;;  %p963_p0 = scmp.lt.s32.totalorder %s961_s24, %s955_s13 }
 0x186   : > { %485 = vrot.lane.b32.xlu1 %v444_v14, %s1060_s30  ;;  %465 = vrot.lane.b32.xlu0 %v444_v14, %s1061_s22  ;;  %p964_p11 = por %p963_p0, %p962_p1 }
 0x188   : > { %p965_p8 = pnand %p964_p11, %p958_p10 }
 0x18a   : > { %505 = vrot.lane.b32.xlu0 %v444_v14, %s1062_s5 }
 0x1f0   : > { %v482_v15 = vpop.permute.xlu1 %481  ;;  %v448_v16 = vpop.permute.xlu0 %447 }
 0x1f4   : > { %v502_v18 = vpop.permute.xlu1 %501  ;;  %v461_v19 = vpop.permute.xlu0 %460 }
 0x1f5   : > { %v463_v20 = vsel %vm453_vm2, %v461_v19, %v448_v16  ;;  %v484_v21 = vsel %vm453_vm2, %v482_v15, %v461_v19  ;;  %v504_v24 = vsel %vm453_vm2, %v502_v18, %v482_v15 }
 0x1f6   : > { %v469_v22 = vmul.f32 %v463_v20, %v445_v17  ;;  %v489_v23 = vmul.f32 %v484_v21, %v445_v17  ;;  %v509_v25 = vmul.f32 %v504_v24, %v445_v17 }
 0x1f8   : > { %491 = vrot.lane.b32.xlu0 %v489_v23, %s1060_s30  ;;  %471 = vrot.lane.b32.xlu1 %v469_v22, %s1061_s22  ;;  %v466_v26 = vpop.permute.xlu0 %465  ;;  %v486_v27 = vpop.permute.xlu1 %485 }
 0x1f9   : > { %v488_v29 = vmul.f32 %v486_v27, %v443_v13  ;;  %v468_v30 = vmul.f32 %v466_v26, %v443_v13 }
 0x1fc   : > { %450 = vrot.lane.b32.xlu0 %v443_v13, %s1063_s29  ;;  %511 = vrot.lane.b32.xlu1 %v509_v25, %s1062_s5  ;;  %v506_v28 = vpop.permute.xlu0 %505 }
 0x1fd   : > { %v508_v35 = vmul.f32 %v506_v28, %v443_v13 }
 0x26a   : > { %v472_v31 = vpop.permute.xlu1 %471  ;;  %v492_v32 = vpop.permute.xlu0 %491 }
 0x26b   : > { %v474_v33 = vadd.f32 %v472_v31, %v468_v30  ;;  %v494_v34 = vadd.f32 %v492_v32, %v488_v29 }
 0x26d   : > { %476 = vrot.lane.b32.xlu1 %v474_v33, %s1064_s26  ;;  %496 = vrot.lane.b32.xlu0 %v494_v34, %s1065_s8 }
 0x26e   : > { %v512_v36 = vpop.permute.xlu1 %511  ;;  %v451_v37 = vpop.permute.xlu0 %450 }
 0x26f   : > { %v514_v38 = vadd.f32 %v512_v36, %v508_v35  ;;  %v454_v39 = vsel %vm453_vm2, %v448_v16, %v451_v37 }
 0x270   : > { %v456_v41 = vmul.f32 %v454_v39, %v445_v17 }
 0x271   : > { %516 = vrot.lane.b32.xlu1 %v514_v38, %s1066_s0 }
 0x272   : > { %v457_v42 = vadd.f32 %v456_v41, %v455_v40 }
 0x274   : > { %459 = vst.msk [vmem:[%s349_s2] sm:$0xff] %vm458_vm3, %v457_v42 }
 0x2df   : > { %v477_v43 = vpop.permute.xlu1 %476  ;;  %v497_v44 = vpop.permute.xlu0 %496 }
 0x2e0   : > { %706 = vst.msk [vmem:[%s349_s2 + $0x8] sm:$0xff] %vm458_vm3, %v477_v43  ;;  %707 = vst.msk [vmem:[%s349_s2 + $0x10] sm:$0xff] %vm458_vm3, %v497_v44 }
 0x2e3   : > { %v517_v45 = vpop.permute.xlu1 %516 }
 0x2e4   : > { %708 = vst.msk [vmem:[%s349_s2 + $0x18] sm:$0xff] %vm458_vm3, %v517_v45 }
 0x2e5   : > { %968 = shalt.err (!%p965_p8)
}
 0x2e6   : > { %s969_s30 = scalar_lea.hbm %s1351_s6, 512  ;;  %s973_s29 = scalar_lea.hbm %s1405_s4, 1024 }
 0x2e7   : > { %p970_p9 = scmp.ne.s32.totalorder %s1351_s6, %s969_s30  ;;  %p974_p13 = scmp.lt.u32.totalorder %s1351_s6, %s1405_s4 }
 0x2e8   : > { %p975_p3 = scmp.lt.u32.totalorder %s973_s29, %s969_s30  ;;  %p977_p5 = scmp.lt.u32.totalorder %s969_s30, %s1351_s6 }
 0x2e9   : > { %p971_p2 = pnand %p970_p9, %p1438_p6 }
 0x2ea   : > { %p976_p7 = por %p975_p3, %p974_p13 }
 0x2eb   : > { %p972_p12 = pneg %p971_p2 }
 0x2ec   : > { %p978_p4 = por %p977_p5, %p976_p7 }
 0x2ee   : > { %p979_p10 = pnand %p978_p4, %p972_p12 }
 0x2f0   : > { %982 = shalt.err (!%p979_p10)
}
 0x2f1   : > { %s1068_s25 = smov 128  }
 0x2f2   : > { %747 = dma.vmem_to_hbm [thread:$0]  (%p1438_p6), %s1346_s11, 512, %s1351_s6, %s522_s9, %s1068_s25, %s1068_s25, %s1061_s22  }
 0x2f3 PF: > { %s553_s0 = sand.u32 1, %s1025_s15   ;;  %p1439_p1 = scmp.ne.s32.totalorder %s1429_s14, 0 }
 0x2f4   : > { %p1440_p0 = scmp.ge.s32.totalorder %s1045_s20, 2  ;;  %s554_s2 = scalar_lea.sflag [#allocation5], %s553_s0 }
 0x2f6   : > { %p764_p11 = pnand %p1440_p0, %p1439_p1 }
 0x2f8   : > { %1020 = dma.done.wait (!%p764_p11), %s554_s2, 512  }
 0x2f9   : > { %1022 = vsyncadd (!%p764_p11), %s554_s2, 4294966784  ;;  %s21_s20 = sadd.s32 1, %s1045_s20   ;;  %s1441_s18 = sld [smem:[#allocation15_spill]] }
 0x2fa   : > { %p18_p8 = scmp.ge.s32.totalorder %s21_s20, 4   ;;  %s1442_s19 = sld [smem:[#allocation16_spill]] }
 0x2fb   : > { %s1443_s15 = smov %s1029_s16  ;;  %s1444_s16 = smov %s1033_s17 }
 0x2fc   : > { %s1445_s17 = smov %s1144_s27  ;;  %20 = sbr.rel (!%p18_p8) target bundleno = 10 (0xa), region = 119 }
 0x303   :  { %559 = vsyncpa [#allocation4], 1 }
 0x304   :  { %561 = vsyncpa [#allocation4 + $0x1], 1 }
 0x305   :  { %562 = vsyncpa [#allocation7], 1 }
 0x306   :  { %563 = vsyncpa [#allocation5], 1 }
 0x307   :  { %565 = vsyncpa [#allocation5 + $0x1], 1 }

</bundles_post_ra>
